<compile_context>
chip_gen: v7x
topology: tpu7x:2x2x1
jax: 0.10.0
libtpu: 0.0.40
codegen_flags: <defaults>
</compile_context>

<pallas_src>
import functools

import jax
import jax.numpy as jnp
from jax.experimental import pallas as pl
from jax.experimental.pallas import tpu as pltpu

NEG_SLOPE = 0.01      # nn.LeakyReLU default
BN_EPS = 1e-5         # nn.BatchNorm1d default
LANE = 128
BF16_ROWS = 16        # bf16 sublane quantum (16, 128)


def _round_up(x, m):
    return (x + m - 1) // m * m


def _pad2(a, rows, cols):
    r, c = a.shape
    return jnp.pad(a, ((0, rows - r), (0, cols - c)))


# ----------------------------------------------------------------------------
# Fused kernel: all hidden blocks + final projection in one invocation.
# refs = [x, w0, (wstack if n_hidden>1), bstack, wf, bf, out]
# ----------------------------------------------------------------------------
def _fc_fused_kernel(*refs, n_hidden, n_tasks):
    x_ref = refs[0]                                   # bf16 (TB, d_in_pad)
    w0_ref = refs[1]                                  # bf16 (d_in_pad, d_fc_pad)
    if n_hidden > 1:
        wstack_ref = refs[2]                          # bf16 (n_hidden-1, d_fc, d_fc)
        off = 3
    else:
        wstack_ref = None
        off = 2
    bstack_ref = refs[off]                            # f32 (n_hidden, d_fc_pad)
    wf_ref = refs[off + 1]                            # bf16 (d_fc_pad, n_tasks_pad)
    bf_ref = refs[off + 2]                            # f32 (1, n_tasks_pad)
    out_ref = refs[off + 3]                           # f32 (TB, n_tasks)

    b_all = bstack_ref[...]                           # tiny, load once

    # Block 0: Linear(d_in -> d_fc), Dropout(eval)=identity, LeakyReLU.
    y = jnp.dot(x_ref[...], w0_ref[...], preferred_element_type=jnp.float32)
    y = y + b_all[0][None, :]
    h = jnp.where(y >= 0.0, y, NEG_SLOPE * y)

    # Blocks 1..n_hidden-1: previous block's BatchNorm affine is folded into
    # these weights/biases at prep time, so each block is just matmul+bias+LeakyReLU.
    for l in range(1, n_hidden):
        w = wstack_ref[l - 1]
        y = jnp.dot(h.astype(jnp.bfloat16), w, preferred_element_type=jnp.float32)
        y = y + b_all[l][None, :]
        h = jnp.where(y >= 0.0, y, NEG_SLOPE * y)

    # Final Linear(d_fc -> n_tasks); last block's BN folded into wf/bf.
    y = jnp.dot(h.astype(jnp.bfloat16), wf_ref[...],
                preferred_element_type=jnp.float32)
    y = y + bf_ref[...]
    # Write only the real task columns -> no 128x HBM write amplification.
    out_ref[...] = y[:, :n_tasks]


# ----------------------------------------------------------------------------
# One-time parameter preparation: fold BN, pad to TPU tiles, cast to bf16.
# ----------------------------------------------------------------------------
def prepare_fc_params(params, n_tasks):
    hidden = params["hidden"]                # [(w, b, bn_scale, bn_shift), ...]
    w_final, b_final = params["final"]
    n_hidden = len(hidden)
    d_in = hidden[0][0].shape[0]
    d_fc = hidden[0][0].shape[1]

    d_in_pad = _round_up(d_in, LANE)
    d_fc_pad = _round_up(d_fc, LANE)
    n_tasks_pad = _round_up(n_tasks, LANE)

    # Fold BN_l (eval affine) into the following Linear:
    #   (y*scale + shift) @ W + b  ==  y @ (diag(scale) W) + (shift @ W + b)
    ws, bs = [], []
    for l, (w, b, _, _) in enumerate(hidden):
        if l == 0:
            ws.append(w)
            bs.append(b)
        else:
            scale, shift = hidden[l - 1][2], hidden[l - 1][3]
            ws.append(scale[:, None] * w)
            bs.append(b + shift @ w)
    scale, shift = hidden[-1][2], hidden[-1][3]
    wf = scale[:, None] * w_final
    bf = b_final + shift @ w_final

    w0_p = _pad2(ws[0], d_in_pad, d_fc_pad).astype(jnp.bfloat16)
    wstack = None
    if n_hidden > 1:
        wstack = jnp.stack(
            [_pad2(w, d_fc_pad, d_fc_pad) for w in ws[1:]]).astype(jnp.bfloat16)
    bstack = jnp.stack(
        [jnp.pad(b, (0, d_fc_pad - d_fc)) for b in bs]).astype(jnp.float32)
    wf_p = _pad2(wf, d_fc_pad, n_tasks_pad).astype(jnp.bfloat16)
    bf_p = jnp.pad(bf, (0, n_tasks_pad - n_tasks)).reshape(1, -1).astype(jnp.float32)

    return {
        "w0": w0_p, "wstack": wstack, "bstack": bstack, "wf": wf_p, "bf": bf_p,
        "n_hidden": n_hidden, "n_tasks": n_tasks,
        "d_in": d_in, "d_in_pad": d_in_pad,
        "d_fc_pad": d_fc_pad, "n_tasks_pad": n_tasks_pad,
    }


# ----------------------------------------------------------------------------
# Forward wrapper: pad+cast the activation, build specs, run fused kernel.
# ----------------------------------------------------------------------------
def fc_forward(prep, h):
    B, d_in = h.shape
    assert d_in == prep["d_in"]
    n_hidden = prep["n_hidden"]
    n_tasks = prep["n_tasks"]
    d_in_pad = prep["d_in_pad"]
    d_fc_pad = prep["d_fc_pad"]
    n_tasks_pad = prep["n_tasks_pad"]

    # Batch tiling (bf16 input => 16-row sublane quantum).
    if B <= BF16_ROWS:
        TB = BF16_ROWS                          # single tile; can't split below 16
    elif B <= 1024:
        TB = _round_up((B + 1) // 2, BF16_ROWS)  # >=2 parallel steps (v7x megacore)
    else:
        TB = 512                                 # big tiles amortize per-step cost
    B_pad = _round_up(B, TB)
    grid = (B_pad // TB,)

    x_p = jnp.pad(h.astype(jnp.bfloat16),
                  ((0, B_pad - B), (0, d_in_pad - d_in)))

    inputs = [x_p, prep["w0"]]
    in_specs = [
        pl.BlockSpec((TB, d_in_pad), lambda i: (i, 0)),
        pl.BlockSpec((d_in_pad, d_fc_pad), lambda i: (0, 0)),
    ]
    if n_hidden > 1:
        inputs.append(prep["wstack"])
        in_specs.append(pl.BlockSpec((n_hidden - 1, d_fc_pad, d_fc_pad),
                                     lambda i: (0, 0, 0)))
    inputs += [prep["bstack"], prep["wf"], prep["bf"]]
    in_specs += [
        pl.BlockSpec((n_hidden, d_fc_pad), lambda i: (0, 0)),
        pl.BlockSpec((d_fc_pad, n_tasks_pad), lambda i: (0, 0)),
        pl.BlockSpec((1, n_tasks_pad), lambda i: (0, 0)),
    ]

    out = pl.pallas_call(
        functools.partial(_fc_fused_kernel, n_hidden=n_hidden, n_tasks=n_tasks),
        out_shape=jax.ShapeDtypeStruct((B_pad, n_tasks), jnp.float32),
        grid=grid,
        in_specs=in_specs,
        out_specs=pl.BlockSpec((TB, n_tasks), lambda i: (i, 0)),
        compiler_params=pltpu.CompilerParams(
            dimension_semantics=("parallel",)),
    )(*inputs)

    return out[:B]


# ----------------------------------------------------------------------------
# Parameter construction (PyTorch-like fan-in uniform init; non-trivial BN
# running stats so the BN-folding path is actually exercised by the check).
# ----------------------------------------------------------------------------
def _linear_params(key, d_in, d_out):
    kw, kb = jax.random.split(key)
    bound = 1.0 / jnp.sqrt(jnp.float32(d_in))
    w = jax.random.uniform(kw, (d_in, d_out), jnp.float32, -bound, bound)
    b = jax.random.uniform(kb, (d_out,), jnp.float32, -bound, bound)
    return w, b


def init_fc_params(key, d_graph_layer, d_FC_layer, n_FC_layer, n_tasks):
    # PyTorch __init__ yields exactly n_FC_layer hidden blocks (two at j==0,
    # one per middle j) plus the final Linear.
    n_hidden = n_FC_layer
    keys = jax.random.split(key, n_hidden + 1)
    hidden = []
    d_in = d_graph_layer
    for i in range(n_hidden):
        kl, kg, kb2, km, kv = jax.random.split(keys[i], 5)
        w, b = _linear_params(kl, d_in, d_FC_layer)
        gamma = jax.random.uniform(kg, (d_FC_layer,), jnp.float32, 0.8, 1.2)
        beta = 0.1 * jax.random.normal(kb2, (d_FC_layer,), jnp.float32)
        run_mean = 0.1 * jax.random.normal(km, (d_FC_layer,), jnp.float32)
        run_var = jax.random.uniform(kv, (d_FC_layer,), jnp.float32, 0.8, 1.2)
        bn_scale = gamma / jnp.sqrt(run_var + BN_EPS)
        bn_shift = beta - run_mean * bn_scale
        hidden.append((w, b, bn_scale, bn_shift))
        d_in = d_FC_layer
    final = _linear_params(keys[n_hidden], d_FC_layer, n_tasks)
    return {"hidden": hidden, "final": final}


# ----------------------------------------------------------------------------
# Pure-JAX reference with the ORIGINAL (unfolded) parameters: bf16 matmuls,
# f32 elementwise LeakyReLU and explicit BN affine (verifies the folding).
# ----------------------------------------------------------------------------
def fc_reference(params, h):
    h = h.astype(jnp.float32)
    for (w, b, bn_scale, bn_shift) in params["hidden"]:
        y = jnp.dot(h.astype(jnp.bfloat16), w.astype(jnp.bfloat16),
                    preferred_element_type=jnp.float32) + b
        y = jnp.where(y >= 0.0, y, NEG_SLOPE * y)
        h = y * bn_scale + bn_shift
    wf, bf = params["final"]
    return jnp.dot(h.astype(jnp.bfloat16), wf.astype(jnp.bfloat16),
                   preferred_element_type=jnp.float32) + bf


if __name__ == "__main__":
    key = jax.random.PRNGKey(0)
    k_param, k_x = jax.random.split(key)

    d_graph_layer = 96
    d_FC_layer = 64
    n_FC_layer = 3
    dropout = 0.1       # identity in eval mode
    n_tasks = 1
    batch = 2

    params = init_fc_params(k_param, d_graph_layer, d_FC_layer,
                            n_FC_layer, n_tasks)
    prep = prepare_fc_params(params, n_tasks=n_tasks)
    x = jax.random.normal(k_x, (batch, d_graph_layer), jnp.float32)

    y = fc_forward(prep, x)
    y = jax.block_until_ready(y)
    assert y.shape == (batch, n_tasks)

    y_ref = fc_reference(params, x)
    assert jnp.allclose(y, y_ref, rtol=3e-2, atol=3e-2), (y, y_ref)

    print("KERNEL_OK")
</pallas_src>

<mosaic_0001>
module attributes {stable_mosaic.version = 11 : i64} {
  func.func @_fc_fused_kernel(%arg0: i32, %arg1: memref<16x128xbf16, #tpu.memory_space<vmem>>, %arg2: memref<128x128xbf16, #tpu.memory_space<vmem>>, %arg3: memref<2x128x128xbf16, #tpu.memory_space<vmem>>, %arg4: memref<3x128xf32, #tpu.memory_space<vmem>>, %arg5: memref<128x128xbf16, #tpu.memory_space<vmem>>, %arg6: memref<1x128xf32, #tpu.memory_space<vmem>>, %arg7: memref<16x1xf32, #tpu.memory_space<vmem>>) attributes {dimension_semantics = [#tpu.dimension_semantics<parallel>], iteration_bounds = array<i64: 1>, scalar_prefetch = 0 : i64, scratch_operands = 0 : i64, tpu.core_type = #tpu.core_type<tc>, window_params = [{transform_indices = @transform_0, window_bounds = array<i64: 16, 128>}, {pipeline_mode = #tpu.pipeline_mode<synchronous>, transform_indices = @transform_1, window_bounds = array<i64: 128, 128>}, {pipeline_mode = #tpu.pipeline_mode<synchronous>, transform_indices = @transform_2, window_bounds = array<i64: 2, 128, 128>}, {pipeline_mode = #tpu.pipeline_mode<synchronous>, transform_indices = @transform_3, window_bounds = array<i64: 3, 128>}, {pipeline_mode = #tpu.pipeline_mode<synchronous>, transform_indices = @transform_4, window_bounds = array<i64: 128, 128>}, {pipeline_mode = #tpu.pipeline_mode<synchronous>, transform_indices = @transform_5, window_bounds = array<i64: 1, 128>}, {transform_indices = @transform_6, window_bounds = array<i64: 16, 1>}]} {
    %c0 = arith.constant 0 : index
    %c0_0 = arith.constant 0 : index
    %0 = vector.load %arg4[%c0, %c0_0] : memref<3x128xf32, #tpu.memory_space<vmem>>, vector<3x128xf32>
    %c0_1 = arith.constant 0 : index
    %c0_2 = arith.constant 0 : index
    %1 = vector.load %arg1[%c0_1, %c0_2] : memref<16x128xbf16, #tpu.memory_space<vmem>>, vector<16x128xbf16>
    %c0_3 = arith.constant 0 : index
    %c0_4 = arith.constant 0 : index
    %2 = vector.load %arg2[%c0_3, %c0_4] : memref<128x128xbf16, #tpu.memory_space<vmem>>, vector<128x128xbf16>
    %cst = arith.constant dense<0.000000e+00> : vector<16x128xf32>
    %3 = tpu.matmul %1, %2, %cst {dimension_numbers = #tpu.dot_dimension_numbers<[1], [0], [0], [1], [0, 0, 1, 1], [], []>} : vector<16x128xbf16>, vector<128x128xbf16>, vector<16x128xf32> -> vector<16x128xf32>
    %4 = vector.extract_strided_slice %0 {offsets = [0, 0], sizes = [1, 128], strides = [1, 1]} : vector<3x128xf32> to vector<1x128xf32>
    %5 = vector.shape_cast %4 : vector<1x128xf32> to vector<128xf32>
    %6 = vector.shape_cast %5 : vector<128xf32> to vector<1x128xf32>
    %7 = vector.broadcast %6 : vector<1x128xf32> to vector<16x128xf32>
    %8 = arith.addf %3, %7 : vector<16x128xf32>
    %cst_5 = arith.constant 0.000000e+00 : f32
    %9 = vector.broadcast %cst_5 : f32 to vector<16x128xf32>
    %10 = arith.cmpf oge, %8, %9 : vector<16x128xf32>
    %cst_6 = arith.constant 0.00999999977 : f32
    %11 = vector.broadcast %cst_6 : f32 to vector<16x128xf32>
    %12 = arith.mulf %11, %8 : vector<16x128xf32>
    %13 = arith.select %10, %8, %12 : vector<16x128xi1>, vector<16x128xf32>
    %c0_7 = arith.constant 0 : index
    %c0_8 = arith.constant 0 : index
    %c0_9 = arith.constant 0 : index
    %14 = vector.load %arg3[%c0_7, %c0_8, %c0_9] : memref<2x128x128xbf16, #tpu.memory_space<vmem>>, vector<1x128x128xbf16>
    %15 = vector.shape_cast %14 : vector<1x128x128xbf16> to vector<128x128xbf16>
    %16 = arith.truncf %13 : vector<16x128xf32> to vector<16x128xbf16>
    %cst_10 = arith.constant dense<0.000000e+00> : vector<16x128xf32>
    %17 = tpu.matmul %16, %15, %cst_10 {dimension_numbers = #tpu.dot_dimension_numbers<[1], [0], [0], [1], [0, 0, 1, 1], [], []>} : vector<16x128xbf16>, vector<128x128xbf16>, vector<16x128xf32> -> vector<16x128xf32>
    %18 = vector.extract_strided_slice %0 {offsets = [1, 0], sizes = [1, 128], strides = [1, 1]} : vector<3x128xf32> to vector<1x128xf32>
    %19 = vector.shape_cast %18 : vector<1x128xf32> to vector<128xf32>
    %20 = vector.shape_cast %19 : vector<128xf32> to vector<1x128xf32>
    %21 = vector.broadcast %20 : vector<1x128xf32> to vector<16x128xf32>
    %22 = arith.addf %17, %21 : vector<16x128xf32>
    %cst_11 = arith.constant 0.000000e+00 : f32
    %23 = vector.broadcast %cst_11 : f32 to vector<16x128xf32>
    %24 = arith.cmpf oge, %22, %23 : vector<16x128xf32>
    %cst_12 = arith.constant 0.00999999977 : f32
    %25 = vector.broadcast %cst_12 : f32 to vector<16x128xf32>
    %26 = arith.mulf %25, %22 : vector<16x128xf32>
    %27 = arith.select %24, %22, %26 : vector<16x128xi1>, vector<16x128xf32>
    %c1 = arith.constant 1 : index
    %c0_13 = arith.constant 0 : index
    %c0_14 = arith.constant 0 : index
    %28 = vector.load %arg3[%c1, %c0_13, %c0_14] : memref<2x128x128xbf16, #tpu.memory_space<vmem>>, vector<1x128x128xbf16>
    %29 = vector.shape_cast %28 : vector<1x128x128xbf16> to vector<128x128xbf16>
    %30 = arith.truncf %27 : vector<16x128xf32> to vector<16x128xbf16>
    %cst_15 = arith.constant dense<0.000000e+00> : vector<16x128xf32>
    %31 = tpu.matmul %30, %29, %cst_15 {dimension_numbers = #tpu.dot_dimension_numbers<[1], [0], [0], [1], [0, 0, 1, 1], [], []>} : vector<16x128xbf16>, vector<128x128xbf16>, vector<16x128xf32> -> vector<16x128xf32>
    %32 = vector.extract_strided_slice %0 {offsets = [2, 0], sizes = [1, 128], strides = [1, 1]} : vector<3x128xf32> to vector<1x128xf32>
    %33 = vector.shape_cast %32 : vector<1x128xf32> to vector<128xf32>
    %34 = vector.shape_cast %33 : vector<128xf32> to vector<1x128xf32>
    %35 = vector.broadcast %34 : vector<1x128xf32> to vector<16x128xf32>
    %36 = arith.addf %31, %35 : vector<16x128xf32>
    %cst_16 = arith.constant 0.000000e+00 : f32
    %37 = vector.broadcast %cst_16 : f32 to vector<16x128xf32>
    %38 = arith.cmpf oge, %36, %37 : vector<16x128xf32>
    %cst_17 = arith.constant 0.00999999977 : f32
    %39 = vector.broadcast %cst_17 : f32 to vector<16x128xf32>
    %40 = arith.mulf %39, %36 : vector<16x128xf32>
    %41 = arith.select %38, %36, %40 : vector<16x128xi1>, vector<16x128xf32>
    %42 = arith.truncf %41 : vector<16x128xf32> to vector<16x128xbf16>
    %c0_18 = arith.constant 0 : index
    %c0_19 = arith.constant 0 : index
    %43 = vector.load %arg5[%c0_18, %c0_19] : memref<128x128xbf16, #tpu.memory_space<vmem>>, vector<128x128xbf16>
    %cst_20 = arith.constant dense<0.000000e+00> : vector<16x128xf32>
    %44 = tpu.matmul %42, %43, %cst_20 {dimension_numbers = #tpu.dot_dimension_numbers<[1], [0], [0], [1], [0, 0, 1, 1], [], []>} : vector<16x128xbf16>, vector<128x128xbf16>, vector<16x128xf32> -> vector<16x128xf32>
    %c0_21 = arith.constant 0 : index
    %c0_22 = arith.constant 0 : index
    %45 = vector.load %arg6[%c0_21, %c0_22] : memref<1x128xf32, #tpu.memory_space<vmem>>, vector<1x128xf32>
    %46 = vector.broadcast %45 : vector<1x128xf32> to vector<16x128xf32>
    %47 = arith.addf %44, %46 : vector<16x128xf32>
    %48 = vector.extract_strided_slice %47 {offsets = [0, 0], sizes = [16, 1], strides = [1, 1]} : vector<16x128xf32> to vector<16x1xf32>
    %c0_23 = arith.constant 0 : index
    %c0_24 = arith.constant 0 : index
    %49 = vector.load %arg7[%c0_23, %c0_24] : memref<16x1xf32, #tpu.memory_space<vmem>>, vector<16x1xf32>
    tpu.vector_store %arg7[%c0_23, %c0_24], %48 {strides = array<i32>} : memref<16x1xf32, #tpu.memory_space<vmem>>, vector<16x1xf32>,
    return
  }
  func.func @transform_0(%arg0: i32) -> (i32, i32) {
    %c0_i32 = arith.constant 0 : i32
    %c0_i32_0 = arith.constant 0 : i32
    return %arg0, %c0_i32 : i32, i32
  }
  func.func @transform_1(%arg0: i32) -> (i32, i32) {
    %c0_i32 = arith.constant 0 : i32
    %c0_i32_0 = arith.constant 0 : i32
    %c0_i32_1 = arith.constant 0 : i32
    return %c0_i32, %c0_i32_0 : i32, i32
  }
  func.func @transform_2(%arg0: i32) -> (i32, i32, i32) {
    %c0_i32 = arith.constant 0 : i32
    %c0_i32_0 = arith.constant 0 : i32
    %c0_i32_1 = arith.constant 0 : i32
    %c0_i32_2 = arith.constant 0 : i32
    return %c0_i32, %c0_i32_0, %c0_i32_1 : i32, i32, i32
  }
  func.func @transform_3(%arg0: i32) -> (i32, i32) {
    %c0_i32 = arith.constant 0 : i32
    %c0_i32_0 = arith.constant 0 : i32
    %c0_i32_1 = arith.constant 0 : i32
    return %c0_i32, %c0_i32_0 : i32, i32
  }
  func.func @transform_4(%arg0: i32) -> (i32, i32) {
    %c0_i32 = arith.constant 0 : i32
    %c0_i32_0 = arith.constant 0 : i32
    %c0_i32_1 = arith.constant 0 : i32
    return %c0_i32, %c0_i32_0 : i32, i32
  }
  func.func @transform_5(%arg0: i32) -> (i32, i32) {
    %c0_i32 = arith.constant 0 : i32
    %c0_i32_0 = arith.constant 0 : i32
    %c0_i32_1 = arith.constant 0 : i32
    return %c0_i32, %c0_i32_0 : i32, i32
  }
  func.func @transform_6(%arg0: i32) -> (i32, i32) {
    %c0_i32 = arith.constant 0 : i32
    %c0_i32_0 = arith.constant 0 : i32
    return %arg0, %c0_i32 : i32, i32
  }
}

</mosaic_0001>

<bundles_post_ra>
// kernel: tpu_custom_call.1
= control target key start
LH: loop header
LB: loop body
LE: loop exit
PB: predicated region body
PF: predicated region fallthrough
CT: control target
= control target key end

     0   :  { %11 = vsyncpa [#allocation3], 0  ;;  %s1018_s0 = inlined_call_operand.hbm [shape: bf16[16,128], index: 0, kind: input, shape index: {}]   ;;  %s1019_s1 = inlined_call_operand.hbm [shape: bf16[128,128], index: 1, kind: input, shape index: {}]   ;;  %s1020_s2 = inlined_call_operand.hbm [shape: bf16[2,128,128], index: 2, kind: input, shape index: {}]   ;;  %s1021_s3 = inlined_call_operand.vmem [shape: f32[3,128], index: 3, kind: input, shape index: {}]   ;;  %s1022_s4 = inlined_call_operand.hbm [shape: bf16[128,128], index: 4, kind: input, shape index: {}]   ;;  %s1023_s5 = inlined_call_operand.vmem [shape: f32[1,128], index: 5, kind: input, shape index: {}]   ;;  %s1024_s6 = inlined_call_operand.vmem [shape: f32[16,1], index: 6, kind: output, shape index: {}]  }
   0x1   :  { %12 = vsyncpa [#allocation5], 0 }
   0x2   :  { %13 = vsyncpa [#allocation8], 0  ;;  %s844_s21 = smov [#allocation4]   ;;  %s845_s23 = smov [#allocation2]  }
   0x3   :  { %s31_s22 = sshll.u32 %s844_s21, 4  ;;  %s19_s24 = sshll.u32 %s845_s23, 4  ;;  %s32_s22 = int_to_ptr.vmem [resolvable:$true] %s31_s22  ;;  %s887_s24 = int_to_ptr.vmem [resolvable:$true] %s19_s24 }
   0x4   :  { %s750_s27 = scalar_lea.hbm %s1019_s1, 1024 }
   0x5   :  { %p751_p0 = scmp.ne.s32.totalorder %s1019_s1, %s750_s27  ;;  %p754_p1 = scmp.lt.u32.totalorder %s750_s27, %s1019_s1 }
   0x7   :  { %p756_p2 = pnand %p754_p1, %p751_p0 }
   0x9   :  { %759 = shalt.err (!%p756_p2)
}
   0xa   :  { %s760_s8 = scalar_lea.vmem %s32_s22, 1024  ;;  %p765_p4 = scmp.lt.s32.totalorder %s32_s22, %s32_s22 }
   0xb   :  { %p761_p3 = scmp.ne.s32.totalorder %s32_s22, %s760_s8  ;;  %p766_p5 = scmp.lt.s32.totalorder %s760_s8, %s760_s8 }
   0xd   :  { %p767_p6 = por %p766_p5, %p765_p4 }
   0xf   :  { %p768_p7 = pnand %p767_p6, %p761_p3 }
  0x11   :  { %771 = shalt.err (!%p768_p7)
}
  0x12   :  { %s846_s9 = smov 64   ;;  %s847_s10 = smov 4  }
  0x13   :  { %37 = dma.hbm_to_vmem [thread:$0]  %s1019_s1, 1024, %s32_s22, [#allocation5], %s846_s9, %s846_s9, %s847_s10  }
  0x14   :  { %s772_s15 = scalar_lea.hbm %s1018_s0, 128 }
  0x15   :  { %p773_p8 = scmp.ne.s32.totalorder %s1018_s0, %s772_s15  ;;  %p776_p9 = scmp.lt.u32.totalorder %s772_s15, %s1018_s0 }
  0x17   :  { %p778_p10 = pnand %p776_p9, %p773_p8 }
  0x19   :  { %781 = shalt.err (!%p778_p10)
}
  0x1a   :  { %s782_s20 = scalar_lea.vmem %s887_s24, 128  ;;  %p787_p12 = scmp.lt.s32.totalorder %s887_s24, %s887_s24 }
  0x1b   :  { %p783_p11 = scmp.ne.s32.totalorder %s887_s24, %s782_s20  ;;  %p788_p13 = scmp.lt.s32.totalorder %s782_s20, %s782_s20 }
  0x1d   :  { %p789_p0 = por %p788_p13, %p787_p12 }
  0x1f   :  { %p790_p1 = pnand %p789_p0, %p783_p11 }
  0x21   :  { %793 = shalt.err (!%p790_p1)
}
  0x22   :  { %25 = dma.hbm_to_vmem [thread:$0]  %s1018_s0, 128, %s887_s24, [#allocation3], %s846_s9, %s846_s9, %s847_s10  }
  0x23   :  { %s848_s22 = smov [#allocation6]   ;;  %s849_s25 = smov [#allocation7]  }
  0x24   :  { %s43_s23 = sshll.u32 %s848_s22, 4  ;;  %s57_s26 = sshll.u32 %s849_s25, 4  ;;  %s44_s23 = int_to_ptr.vmem [resolvable:$true] %s43_s23  ;;  %s924_s26 = int_to_ptr.vmem [resolvable:$true] %s57_s26 }
  0x25   :  { %s794_s29 = scalar_lea.hbm %s1020_s2, 2048 }
  0x26   :  { %p795_p2 = scmp.ne.s32.totalorder %s1020_s2, %s794_s29  ;;  %p798_p3 = scmp.lt.u32.totalorder %s794_s29, %s1020_s2 }
  0x28   :  { %p800_p4 = pnand %p798_p3, %p795_p2 }
  0x2a   :  { %803 = shalt.err (!%p800_p4)
}
  0x2b   :  { %s804_s0 = scalar_lea.vmem %s44_s23, 2048  ;;  %p809_p6 = scmp.lt.s32.totalorder %s44_s23, %s44_s23 }
  0x2c   :  { %p805_p5 = scmp.ne.s32.totalorder %s44_s23, %s804_s0  ;;  %p810_p7 = scmp.lt.s32.totalorder %s804_s0, %s804_s0 }
  0x2e   :  { %p811_p8 = por %p810_p7, %p809_p6 }
  0x30   :  { %p812_p9 = pnand %p811_p8, %p805_p5 }
  0x32   :  { %815 = shalt.err (!%p812_p9)
}
  0x33   :  { %49 = dma.hbm_to_vmem [thread:$0]  %s1020_s2, 2048, %s44_s23, [#allocation5], %s846_s9, %s846_s9, %s847_s10  }
  0x34   :  { %s816_s15 = scalar_lea.hbm %s1022_s4, 1024 }
  0x35   :  { %p817_p10 = scmp.ne.s32.totalorder %s1022_s4, %s816_s15  ;;  %p820_p11 = scmp.lt.u32.totalorder %s816_s15, %s1022_s4 }
  0x37   :  { %p822_p12 = pnand %p820_p11, %p817_p10 }
  0x39   :  { %825 = shalt.err (!%p822_p12)
}
  0x3a   :  { %s826_s20 = scalar_lea.vmem %s924_s26, 1024  ;;  %p831_p0 = scmp.lt.s32.totalorder %s924_s26, %s924_s26 }
  0x3b   :  { %p827_p13 = scmp.ne.s32.totalorder %s924_s26, %s826_s20  ;;  %p832_p1 = scmp.lt.s32.totalorder %s826_s20, %s826_s20 }
  0x3d   :  { %p833_p2 = por %p832_p1, %p831_p0 }
  0x3f   :  { %p834_p3 = pnand %p833_p2, %p827_p13 }
  0x41   :  { %837 = shalt.err (!%p834_p3)
}
  0x42   :  { %63 = dma.hbm_to_vmem [thread:$0]  %s1022_s4, 1024, %s924_s26, [#allocation8], %s846_s9, %s846_s9, %s847_s10  }
  0x43   :  { %838 = dma.done.wait [#allocation3], 128  }
  0x44   :  { %839 = vsyncadd [#allocation3], 4294967168 }
  0x45   :  { %840 = dma.done.wait [#allocation5], 3072  }
  0x46   :  { %841 = vsyncadd [#allocation5], 4294964224 }
  0x47   :  { %842 = dma.done.wait [#allocation8], 1024  }
  0x48   :  { %843 = vsyncadd [#allocation8], 4294966272  ;;  %v850_v0 = vmov 0.0   ;;  %vm851_vm0 = vmmov 0   ;;  %v717_v1 = vld [vmem:[#allocation4] sm:$0xff]   ;;  %v718_v2 = vld [vmem:[#allocation4 + $0x8] sm:$0xff]   ;;  %v98_v24 = vlaneseq }
  0x49   :  { %629 = vmatprep.subr.bf16.mxu0 %v850_v0  ;;  %645 = vmatprep.mubr.msk.bf16.mxu0 %vm851_vm0, %v850_v0  ;;  %v719_v3 = vld [vmem:[#allocation4 + $0x10] sm:$0xff]   ;;  %v726_v4 = vld [vmem:[#allocation6] sm:$0xff]   ;;  %v720_v5 = vld [vmem:[#allocation4 + $0x18] sm:$0xff]   ;;  %vm549_vm7 = vcmask 7168  }
  0x4a   :  { %649 = vmatprep.subr.bf16.mxu1 %v850_v0  ;;  %665 = vmatprep.mubr.msk.bf16.mxu1 %vm851_vm0, %v850_v0  ;;  %v727_v6 = vld [vmem:[#allocation6 + $0x8] sm:$0xff]   ;;  %v721_v7 = vld [vmem:[#allocation4 + $0x20] sm:$0xff]   ;;  %v728_v8 = vld [vmem:[#allocation6 + $0x10] sm:$0xff]   ;;  %v991_v25 = vshrl.u32 %v98_v24, 7 }
  0x4b   :  { %630 = vmatpush3.bf16.msra.mxu0 %v717_v1  ;;  %650 = vmatpush3.bf16.msra.mxu1 %v726_v4  ;;  %v722_v9 = vld [vmem:[#allocation4 + $0x28] sm:$0xff]   ;;  %v729_v10 = vld [vmem:[#allocation6 + $0x18] sm:$0xff]   ;;  %v723_v11 = vld [vmem:[#allocation4 + $0x30] sm:$0xff]  }
  0x4c   :  { %631 = vmatprep.subr.bf16.mxu0 %v850_v0  ;;  %651 = vmatprep.subr.bf16.mxu1 %v850_v0  ;;  %v730_v12 = vld [vmem:[#allocation6 + $0x20] sm:$0xff]   ;;  %v724_v13 = vld [vmem:[#allocation4 + $0x38] sm:$0xff]   ;;  %v731_v14 = vld [vmem:[#allocation6 + $0x28] sm:$0xff]   ;;  %v100_v26 = vsub.s32 0, %v991_v25  ;;  %v222_v48 = vsub.s32 1, %v991_v25  ;;  %v339_v63 = vsub.s32 2, %v991_v25 }
  0x4d   :  { %v725_v15 = vld [vmem:[#allocation2] sm:$0xff]   ;;  %v732_v16 = vld [vmem:[#allocation6 + $0x30] sm:$0xff]   ;;  %v734_v18 = vld [vmem:[#allocation6 + $0x40] sm:$0xff]  }
  0x4e   :  { %v733_v17 = vld [vmem:[#allocation6 + $0x38] sm:$0xff]   ;;  %v735_v19 = vld [vmem:[#allocation6 + $0x48] sm:$0xff]   ;;  %v736_v20 = vld [vmem:[#allocation6 + $0x50] sm:$0xff]  }
  0x4f   :  { %632 = vmatpush3.bf16.msra.mxu0 %v718_v2  ;;  %652 = vmatpush3.bf16.msra.mxu1 %v727_v6  ;;  %v737_v21 = vld [vmem:[#allocation6 + $0x58] sm:$0xff]   ;;  %v738_v22 = vld [vmem:[#allocation6 + $0x60] sm:$0xff]   ;;  %v739_v23 = vld [vmem:[#allocation6 + $0x68] sm:$0xff]  }
  0x50   :  { %633 = vmatprep.subr.bf16.mxu0 %v850_v0  ;;  %653 = vmatprep.subr.bf16.mxu1 %v850_v0  ;;  %v79_v27 = vld [vmem:[%s1021_s3] sm:$0x7]  ;;  %v740_v40 = vld [vmem:[#allocation6 + $0x70] sm:$0xff]   ;;  %v742_v42 = vld [vmem:[#allocation7] sm:$0xff]  }
  0x51   :  { %v101_v28 = vrot.slane %v79_v27, %v100_v26  ;;  %v741_v41 = vld [vmem:[#allocation6 + $0x78] sm:$0xff]   ;;  %v743_v43 = vld [vmem:[#allocation7 + $0x8] sm:$0xff]   ;;  %v744_v44 = vld [vmem:[#allocation7 + $0x10] sm:$0xff]   ;;  %v223_v49 = vrot.slane %v79_v27, %v222_v48  ;;  %v340_v1 = vrot.slane %v79_v27, %v339_v63 }
  0x52   :  { %v745_v45 = vld [vmem:[#allocation7 + $0x18] sm:$0xff]   ;;  %v746_v46 = vld [vmem:[#allocation7 + $0x20] sm:$0xff]   ;;  %v747_v47 = vld [vmem:[#allocation7 + $0x28] sm:$0xff]  }
  0x53   :  { %634 = vmatpush3.bf16.msra.mxu0 %v719_v3  ;;  %654 = vmatpush3.bf16.msra.mxu1 %v728_v8  ;;  %v748_v61 = vld [vmem:[#allocation7 + $0x30] sm:$0xff]   ;;  %v749_v62 = vld [vmem:[#allocation7 + $0x38] sm:$0xff]  }
  0x54   :  { %635 = vmatprep.subr.bf16.mxu0 %v850_v0  ;;  %655 = vmatprep.subr.bf16.mxu1 %v850_v0 }
  0x57   :  { %636 = vmatpush3.bf16.msra.mxu0 %v720_v5  ;;  %656 = vmatpush3.bf16.msra.mxu1 %v729_v10 }
  0x58   :  { %637 = vmatprep.subr.bf16.mxu0 %v850_v0  ;;  %657 = vmatprep.subr.bf16.mxu1 %v850_v0 }
  0x5b   :  { %638 = vmatpush3.bf16.msra.mxu0 %v721_v7  ;;  %658 = vmatpush3.bf16.msra.mxu1 %v730_v12 }
  0x5c   :  { %639 = vmatprep.subr.bf16.mxu0 %v850_v0  ;;  %659 = vmatprep.subr.bf16.mxu1 %v850_v0 }
  0x5f   :  { %640 = vmatpush3.bf16.msra.mxu0 %v722_v9  ;;  %660 = vmatpush3.bf16.msra.mxu1 %v731_v14 }
  0x60   :  { %641 = vmatprep.subr.bf16.mxu0 %v850_v0  ;;  %661 = vmatprep.subr.bf16.mxu1 %v850_v0 }
  0x63   :  { %642 = vmatpush3.bf16.msra.mxu0 %v723_v11  ;;  %662 = vmatpush3.bf16.msra.mxu1 %v732_v16 }
  0x64   :  { %643 = vmatprep.subr.bf16.mxu0 %v850_v0  ;;  %663 = vmatprep.subr.bf16.mxu1 %v850_v0 }
  0x67   :  { %644 = vmatpush3.bf16.msra.mxu0 %v724_v13  ;;  %664 = vmatpush3.bf16.msra.mxu1 %v733_v17 }
  0x68   :  { %669 = vmatprep.subr.bf16.mxu0 %v850_v0  ;;  %689 = vmatprep.subr.bf16.mxu1 %v850_v0 }
  0x6a   :  { %646 = vmatmul.mubr.bf16.vlgmr.msra.gmra.mrb[0].mxu0 %v725_v15 }
  0x6b   :  { %685 = vmatprep.mubr.msk.bf16.mxu0 %vm851_vm0, %v850_v0  ;;  %670 = vmatpush3.bf16.msra.mxu0 %v734_v18 }
  0x6c   :  { %671 = vmatprep.subr.bf16.mxu0 %v850_v0 }
  0x6f   :  { %672 = vmatpush3.bf16.msra.mxu0 %v735_v19 }
  0x70   :  { %673 = vmatprep.subr.bf16.mxu0 %v850_v0 }
  0x73   :  { %674 = vmatpush3.bf16.msra.mxu0 %v736_v20 }
  0x74   :  { %675 = vmatprep.subr.bf16.mxu0 %v850_v0 }
  0x77   :  { %676 = vmatpush3.bf16.msra.mxu0 %v737_v21 }
  0x78   :  { %677 = vmatprep.subr.bf16.mxu0 %v850_v0 }
  0x7b   :  { %678 = vmatpush3.bf16.msra.mxu0 %v738_v22 }
  0x7c   :  { %679 = vmatprep.subr.bf16.mxu0 %v850_v0 }
  0x7f   :  { %680 = vmatpush3.bf16.msra.mxu0 %v739_v23 }
  0x80   :  { %681 = vmatprep.subr.bf16.mxu0 %v850_v0 }
  0x83   :  { %682 = vmatpush3.bf16.msra.mxu0 %v740_v40 }
  0x84   :  { %683 = vmatprep.subr.bf16.mxu0 %v850_v0 }
  0x87   :  { %684 = vmatpush3.bf16.msra.mxu0 %v741_v41 }
 0x13d   :  { %v190_v29 = vpop.f32.mrb[0].mxu0 }
 0x13e   :  { %v191_v30 = vadd.f32 %v190_v29, %v101_v28  ;;  %v647_v31 = vpop.f32.mrb[1].mxu0 }
 0x13f   :  { %v193_v32 = vpop.f32.mrb[2].mxu0 }
 0x140   :  { %v199_v33 = vmul.f32 0.01, %v191_v30  ;;  %v194_v34 = vadd.f32 %v193_v32, %v101_v28  ;;  %v648_v35 = vpop.f32.mrb[3].mxu0  ;;  %vm197_vm1 = vcmp.ge.f32.partialorder %v191_v30, 0.0 }
 0x142   :  { %vm198_vm2 = vcmp.ge.f32.partialorder %v194_v34, 0.0  ;;  %v200_v36 = vmul.f32 0.01, %v194_v34  ;;  %v201_v37 = vsel %vm197_vm1, %v191_v30, %v199_v33 }
 0x144   :  { %v202_v38 = vsel %vm198_vm2, %v194_v34, %v200_v36 }
 0x145   :  { %v219_v39 = vpack.c.bf16 %v202_v38, %v201_v37 }
 0x147   :  { %666 = vmatmul.mubr.bf16.vlgmr.msra.gmra.mrb[0].mxu1 %v219_v39 }
 0x148   :  { %705 = vmatprep.mubr.msk.bf16.mxu1 %vm851_vm0, %v850_v0  ;;  %690 = vmatpush3.bf16.msra.mxu1 %v742_v42 }
 0x149   :  { %691 = vmatprep.subr.bf16.mxu1 %v850_v0 }
 0x14c   :  { %692 = vmatpush3.bf16.msra.mxu1 %v743_v43 }
 0x14d   :  { %693 = vmatprep.subr.bf16.mxu1 %v850_v0 }
 0x150   :  { %694 = vmatpush3.bf16.msra.mxu1 %v744_v44 }
 0x151   :  { %695 = vmatprep.subr.bf16.mxu1 %v850_v0 }
 0x154   :  { %696 = vmatpush3.bf16.msra.mxu1 %v745_v45 }
 0x155   :  { %697 = vmatprep.subr.bf16.mxu1 %v850_v0 }
 0x158   :  { %698 = vmatpush3.bf16.msra.mxu1 %v746_v46 }
 0x159   :  { %699 = vmatprep.subr.bf16.mxu1 %v850_v0 }
 0x15c   :  { %700 = vmatpush3.bf16.msra.mxu1 %v747_v47 }
 0x15d   :  { %701 = vmatprep.subr.bf16.mxu1 %v850_v0 }
 0x160   :  { %702 = vmatpush3.bf16.msra.mxu1 %v748_v61 }
 0x161   :  { %703 = vmatprep.subr.bf16.mxu1 %v850_v0  ;;  %v584_v0 = vld [vmem:[%s1023_s5] ss:$0 sm:$0xff] }
 0x164   :  { %704 = vmatpush3.bf16.msra.mxu1 %v749_v62 }
 0x21a   :  { %v306_v50 = vpop.f32.mrb[0].mxu1 }
 0x21b   :  { %v307_v51 = vadd.f32 %v306_v50, %v223_v49  ;;  %v667_v52 = vpop.f32.mrb[1].mxu1 }
 0x21c   :  { %v309_v53 = vpop.f32.mrb[2].mxu1 }
 0x21d   :  { %v315_v54 = vmul.f32 0.01, %v307_v51  ;;  %v310_v55 = vadd.f32 %v309_v53, %v223_v49  ;;  %v668_v56 = vpop.f32.mrb[3].mxu1  ;;  %vm313_vm3 = vcmp.ge.f32.partialorder %v307_v51, 0.0 }
 0x21f   :  { %vm314_vm4 = vcmp.ge.f32.partialorder %v310_v55, 0.0  ;;  %v316_v57 = vmul.f32 0.01, %v310_v55  ;;  %v317_v58 = vsel %vm313_vm3, %v307_v51, %v315_v54 }
 0x221   :  { %v318_v59 = vsel %vm314_vm4, %v310_v55, %v316_v57 }
 0x222   :  { %v336_v60 = vpack.c.bf16 %v318_v59, %v317_v58 }
 0x224   :  { %686 = vmatmul.mubr.bf16.vlgmr.msra.gmra.mrb[4].mxu0 %v336_v60 }
 0x2f7   :  { %v423_v2 = vpop.f32.mrb[4].mxu0 }
 0x2f8   :  { %v424_v3 = vadd.f32 %v423_v2, %v340_v1  ;;  %v687_v4 = vpop.f32.mrb[5].mxu0 }
 0x2f9   :  { %v426_v5 = vpop.f32.mrb[6].mxu0 }
 0x2fa   :  { %v432_v6 = vmul.f32 0.01, %v424_v3  ;;  %v427_v7 = vadd.f32 %v426_v5, %v340_v1  ;;  %v688_v8 = vpop.f32.mrb[7].mxu0  ;;  %vm430_vm5 = vcmp.ge.f32.partialorder %v424_v3, 0.0 }
 0x2fc   :  { %vm431_vm6 = vcmp.ge.f32.partialorder %v427_v7, 0.0  ;;  %v433_v9 = vmul.f32 0.01, %v427_v7  ;;  %v434_v10 = vsel %vm430_vm5, %v424_v3, %v432_v6 }
 0x2fe   :  { %v435_v11 = vsel %vm431_vm6, %v427_v7, %v433_v9 }
 0x2ff   :  { %v436_v12 = vpack.c.bf16 %v435_v11, %v434_v10 }
 0x301   :  { %706 = vmatmul.mubr.bf16.vlgmr.msra.gmra.mrb[4].mxu1 %v436_v12 }
 0x3d4   :  { %v542_v13 = vpop.f32.mrb[4].mxu1 }
 0x3d5   :  { %v543_v14 = vadd.f32 %v584_v0, %v542_v13  ;;  %v707_v15 = vpop.f32.mrb[5].mxu1 }
 0x3d6   :  { %v545_v16 = vpop.f32.mrb[6].mxu1 }
 0x3d7   :  { %550 = vst.msk [vmem:[%s1024_s6] sm:$0xff] %vm549_vm7, %v543_v14  ;;  %v546_v17 = vadd.f32 %v584_v0, %v545_v16  ;;  %v708_v18 = vpop.f32.mrb[7].mxu1 }
 0x3d9   :  { %551 = vst.msk [vmem:[%s1024_s6 + $0x8] sm:$0xff] %vm549_vm7, %v546_v17 }
 0x3da   :  { %556 = vsyncpa [#allocation3], 1 }
 0x3db   :  { %557 = vsyncpa [#allocation5], 1 }
 0x3dc   :  { %558 = vsyncpa [#allocation8], 1 }

</bundles_post_ra>
